<compile_context>
chip_gen: v5e
topology: v5e:2x2
jax: 0.10.0
libtpu: 0.0.40
codegen_flags: <defaults>
</compile_context>

<pallas_src>
import functools

import jax
import jax.numpy as jnp
from jax.experimental import pallas as pl
from jax.experimental.pallas import tpu as pltpu


_LANE = 128
_LANE_PAD_BYTES = _LANE * 4      # a (tile_b, 1) i32/f32 block lane-pads to (tile_b, 128)


# ----------------------------------------------------------------------------- kernel
def _margin_loss_kernel(logits_ref, labels_ref, out_ref, corr_ref, minc_ref, *,
                        num_classes, kappa, targeted):
    # logits_ref: (tile_b, tile_c) native dtype; labels_ref: (tile_b, 1) int32
    # out_ref: (tile_b, 1) f32; corr_ref / minc_ref: (tile_b, 1) f32 scratch.
    j = pl.program_id(1)

    @pl.when(j == 0)
    def _init():
        corr_ref[...] = jnp.zeros(corr_ref.shape, corr_ref.dtype)
        minc_ref[...] = jnp.full(minc_ref.shape, -jnp.inf, minc_ref.dtype)

    logits = logits_ref[...]
    # Keep f32 / bf16 / f16 in their native dtype (both row reductions are exact
    # element picks / maxes, so this is bit-identical and avoids a full-tile f32
    # copy in VMEM).  Widen anything exotic (int8 / fp8) so the math is safe.
    if not (jnp.issubdtype(logits.dtype, jnp.floating) and logits.dtype.itemsize >= 2):
        logits = logits.astype(jnp.float32)
    labels = labels_ref[...]                                   # (tile_b, 1)
    tb, tc = logits.shape

    # Global class ids covered by this block of the class axis.
    col = jax.lax.broadcasted_iota(jnp.int32, (tb, tc), 1) + j * tc
    label_mask = col == labels                                 # one-hot per row (within block)

    # z_y(x): one-hot pick via masked sum (exact in any float dtype: every other
    # term is exactly 0).  Accumulated in f32 across class blocks.
    corr_part = jnp.sum(jnp.where(label_mask, logits, 0.0), axis=1, keepdims=True)
    corr_ref[...] += corr_part.astype(jnp.float32)

    # max_{k != y} z_k(x): masked max.  Also mask the class-padding columns when
    # the last class block extends past C (their contents are uninitialised).
    drop = label_mask
    if num_classes % tc != 0:
        drop = drop | (col >= num_classes)
    inc_part = jnp.max(jnp.where(drop, -jnp.inf, logits), axis=1, keepdims=True)
    minc_ref[...] = jnp.maximum(minc_ref[...], inc_part.astype(jnp.float32))

    @pl.when(j == pl.num_programs(1) - 1)
    def _finalize():
        corr = corr_ref[...]
        minc = minc_ref[...]
        margin = (corr - minc) if targeted else (minc - corr)
        if kappa != float("inf"):                # trace-time: skip a no-op clamp
            margin = jnp.minimum(margin, jnp.float32(kappa))
        out_ref[...] = margin


# ----------------------------------------------------------------------------- planning
def _cdiv(a, b):
    return -(-a // b)


def _round_up(x, m):
    return _cdiv(x, m) * m


def _round_down(x, m):
    return (x // m) * m


def _sublane_align(itemsize):
    # Rows per packed (8, 128) native tile: 8 for 32-bit, 16 for 16-bit, 32 for 8-bit.
    return 8 * max(1, 4 // max(1, itemsize))


def _vmem_capacity_bytes():
    try:
        info = pltpu.get_tpu_info()
        for name in ("vmem_capacity_bytes", "vmem_size_bytes", "vmem_bytes"):
            v = getattr(info, name, None)
            if v:
                return int(v)
    except Exception:
        pass
    return 64 * 2**20            # assume the smallest (v7x-class) part: conservative


def _plan_tiles(batch, num_classes, itemsize):
    cap = _vmem_capacity_bytes()
    if cap <= 64 * 2**20:        # v7x-class: 64 MiB VMEM per TensorCore
        blk_budget = 8 * 2**20   # logits bytes per live block
        ws_budget = 36 * 2**20   # total double-buffered working set
    else:                        # v5e / v6e: 128 MiB physical VMEM
        blk_budget = 14 * 2**20
        ws_budget = 80 * 2**20

    align = _sublane_align(itemsize)

    # Class axis: keep whole rows unless even `align` rows of full C blow the
    # block budget (vocab-scale C); then tile C in multiples of 128.
    if align * num_classes * itemsize <= blk_budget:
        tile_c = num_classes
    else:
        tile_c = max(_LANE, _round_down(blk_budget // (align * itemsize), _LANE))

    # Batch axis, sized by bytes.  Per-row VMEM cost: double-buffered logits row
    # + lane-padded label/output blocks (x2 buffers each) + 2 f32 scratch rows.
    row_bytes = 2 * tile_c * itemsize + 6 * _LANE_PAD_BYTES
    tile_b = min(batch,
                 blk_budget // max(1, tile_c * itemsize),
                 ws_budget // row_bytes)
    # Guarantee >= 2 batch grid steps (alignment permitting) so both v7x
    # TensorCores participate; harmless on single-TC v5e/v6e.
    if batch > align:
        tile_b = min(tile_b, _round_up(_cdiv(batch, 2), align))
    if tile_b < batch:
        tile_b = max(align, _round_down(tile_b, align))   # sublane/packing alignment
        if tile_b >= batch:
            tile_b = batch
    else:
        tile_b = batch
    return int(tile_b), int(tile_c), cap


def _vmem_limit_bytes(tile_b, tile_c, itemsize, cap):
    ws = tile_b * (2 * tile_c * itemsize + 6 * _LANE_PAD_BYTES) + 4 * tile_c * itemsize
    limit = max(16 * 2**20, int(ws * 1.4))
    return int(min(limit, cap * 3 // 4))


# ----------------------------------------------------------------------------- wrapper
def margin_loss(logits, labels, kappa=float("inf"), targeted=False,
                tile_b=None, tile_c=None):
    if logits.ndim != 2:
        raise ValueError(f"logits must be [batch, classes], got {logits.shape}")
    B, C = logits.shape
    # kappa / targeted select the clamp and the sign of the margin at trace time;
    # float()/bool() raise loudly if a traced value is passed by mistake.
    kappa = float(kappa)
    targeted = bool(targeted)

    itemsize = jnp.dtype(logits.dtype).itemsize
    auto_tb, auto_tc, cap = _plan_tiles(B, C, itemsize)
    tile_b = int(min(auto_tb if tile_b is None else tile_b, B))
    tile_c = int(min(auto_tc if tile_c is None else tile_c, C))

    labels2d = labels.reshape(B, 1).astype(jnp.int32)
    grid = (pl.cdiv(B, tile_b), pl.cdiv(C, tile_c))
    vmem_limit = _vmem_limit_bytes(tile_b, tile_c, itemsize, cap)

    kernel = functools.partial(_margin_loss_kernel, num_classes=C,
                               kappa=kappa, targeted=targeted)
    out = pl.pallas_call(
        kernel,
        out_shape=jax.ShapeDtypeStruct((B, 1), jnp.float32),
        grid=grid,
        in_specs=[
            pl.BlockSpec((tile_b, tile_c), lambda i, j: (i, j)),   # logits, native dtype
            pl.BlockSpec((tile_b, 1), lambda i, j: (i, 0)),        # labels
        ],
        out_specs=pl.BlockSpec((tile_b, 1), lambda i, j: (i, 0)),
        scratch_shapes=[pltpu.VMEM((tile_b, 1), jnp.float32),      # running z_y
                        pltpu.VMEM((tile_b, 1), jnp.float32)],     # running max_{k!=y}
        compiler_params=pltpu.CompilerParams(
            dimension_semantics=("parallel", "arbitrary"),
            vmem_limit_bytes=vmem_limit),
    )(logits, labels2d)
    return out.reshape(B)                                          # PyTorch .squeeze()


class MarginLoss:
    """Drop-in mirror of the PyTorch module (forward only)."""

    def __init__(self, kappa=float("inf"), targeted=False):
        self.kappa = kappa
        self.targeted = targeted

    def __call__(self, logits, labels):
        return margin_loss(logits, labels, self.kappa, self.targeted)


# ----------------------------------------------------------------------------- reference & tests
def _margin_loss_ref(logits, labels, kappa=float("inf"), targeted=False):
    # Pure-JAX reference mirroring the PyTorch top-2 formulation.
    B, C = logits.shape
    logits = logits.astype(jnp.float32)
    correct = jnp.take_along_axis(logits, labels.reshape(-1, 1), axis=1)
    top_max = jnp.max(logits, axis=1, keepdims=True)
    top_argmax = jnp.argmax(logits, axis=1, keepdims=True)
    masked = jnp.where(
        jax.lax.broadcasted_iota(jnp.int32, (B, C), 1) == top_argmax,
        -jnp.inf, logits)
    second_max = jnp.max(masked, axis=1, keepdims=True)
    eq = top_argmax == labels.reshape(-1, 1)
    max_incorrect = jnp.where(eq, second_max, top_max)
    margin = (correct - max_incorrect) if targeted else (max_incorrect - correct)
    return jnp.minimum(margin, kappa).reshape(-1)


if __name__ == "__main__":
    key = jax.random.PRNGKey(0)
    k_logits, k_labels = jax.random.split(key)
    B, C = 8, 16
    logits = jax.random.normal(k_logits, (B, C), dtype=jnp.float32)
    labels = jax.random.randint(k_labels, (B,), 0, C, dtype=jnp.int32)

    # 1) Untargeted, kappa = inf (default), via the module-style wrapper.
    out = jax.block_until_ready(MarginLoss()(logits, labels))
    ref = _margin_loss_ref(logits, labels)
    assert out.shape == (B,)
    assert jnp.allclose(out, ref, atol=1e-6), (out, ref)

    # 2) Targeted, finite kappa.
    out_t = jax.block_until_ready(margin_loss(logits, labels, kappa=0.5, targeted=True))
    ref_t = _margin_loss_ref(logits, labels, kappa=0.5, targeted=True)
    assert jnp.allclose(out_t, ref_t, atol=1e-6), (out_t, ref_t)

    # 3) Native bf16 pass-through (reductions stay in bf16 inside the kernel).
    logits_bf16 = logits.astype(jnp.bfloat16)
    out_b = jax.block_until_ready(margin_loss(logits_bf16, labels))
    ref_b = _margin_loss_ref(logits_bf16.astype(jnp.float32), labels)
    assert jnp.allclose(out_b, ref_b, atol=1e-5), (out_b, ref_b)

    # 4) Batch that does not divide the tile: exercises the partial last batch block.
    B2 = 20
    k2l, k2y = jax.random.split(jax.random.PRNGKey(1))
    logits2 = jax.random.normal(k2l, (B2, C), dtype=jnp.float32)
    labels2 = jax.random.randint(k2y, (B2,), 0, C, dtype=jnp.int32)
    out2 = jax.block_until_ready(margin_loss(logits2, labels2, tile_b=8))
    ref2 = _margin_loss_ref(logits2, labels2)
    assert out2.shape == (B2,)
    assert jnp.allclose(out2, ref2, atol=1e-6), (out2, ref2)

    # 5a) Class-axis tiling (C divisible by tile_c): 2x3 grid with accumulators.
    B3, C3 = 16, 384
    k3l, k3y = jax.random.split(jax.random.PRNGKey(2))
    logits3 = jax.random.normal(k3l, (B3, C3), dtype=jnp.float32)
    labels3 = jax.random.randint(k3y, (B3,), 0, C3, dtype=jnp.int32)
    out3 = jax.block_until_ready(margin_loss(logits3, labels3, tile_c=128))
    ref3 = _margin_loss_ref(logits3, labels3)
    assert jnp.allclose(out3, ref3, atol=1e-6), (out3, ref3)

    # 5b) Class-axis tiling with C NOT divisible by tile_c: exercises the
    #     padded-column mask in the last class block.
    B4, C4 = 16, 200
    k4l, k4y = jax.random.split(jax.random.PRNGKey(3))
    logits4 = jax.random.normal(k4l, (B4, C4), dtype=jnp.float32)
    labels4 = jax.random.randint(k4y, (B4,), 0, C4, dtype=jnp.int32)
    out4 = jax.block_until_ready(margin_loss(logits4, labels4, tile_c=128))
    ref4 = _margin_loss_ref(logits4, labels4)
    assert jnp.allclose(out4, ref4, atol=1e-6), (out4, ref4)

    print("KERNEL_OK")
</pallas_src>

<mosaic_0001>
module attributes {stable_mosaic.version = 11 : i64} {
  func.func @_margin_loss_kernel(%arg0: i32, %arg1: i32, %arg2: memref<8x16xf32, #tpu.memory_space<vmem>>, %arg3: memref<8x1xi32, #tpu.memory_space<vmem>>, %arg4: memref<8x1xf32, #tpu.memory_space<vmem>>, %arg5: memref<8x1xf32, #tpu.memory_space<vmem>>, %arg6: memref<8x1xf32, #tpu.memory_space<vmem>>) attributes {dimension_semantics = [#tpu.dimension_semantics<parallel>, #tpu.dimension_semantics<arbitrary>], iteration_bounds = array<i64: 1, 1>, scalar_prefetch = 0 : i64, scratch_operands = 2 : i64, tpu.core_type = #tpu.core_type<tc>, window_params = [{transform_indices = @transform_0, window_bounds = array<i64: 8, 16>}, {transform_indices = @transform_1, window_bounds = array<i64: 8, 1>}, {transform_indices = @transform_2, window_bounds = array<i64: 8, 1>}]} {
    %c0_i32 = arith.constant 0 : i32
    %0 = arith.cmpi eq, %arg1, %c0_i32 : i32
    %1 = arith.extui %0 : i1 to i32
    %c0_i32_0 = arith.constant 0 : i32
    %2 = arith.cmpi ne, %1, %c0_i32_0 : i32
    scf.if %2 {
      %cst_17 = arith.constant 0.000000e+00 : f32
      %28 = vector.broadcast %cst_17 : f32 to vector<8x1xf32>
      %c0_18 = arith.constant 0 : index
      %c0_19 = arith.constant 0 : index
      %29 = vector.load %arg5[%c0_18, %c0_19] : memref<8x1xf32, #tpu.memory_space<vmem>>, vector<8x1xf32>
      tpu.vector_store %arg5[%c0_18, %c0_19], %28 {strides = array<i32>} : memref<8x1xf32, #tpu.memory_space<vmem>>, vector<8x1xf32>,
      %cst_20 = arith.constant 0xFF800000 : f32
      %30 = vector.broadcast %cst_20 : f32 to vector<8x1xf32>
      %c0_21 = arith.constant 0 : index
      %c0_22 = arith.constant 0 : index
      %31 = vector.load %arg6[%c0_21, %c0_22] : memref<8x1xf32, #tpu.memory_space<vmem>>, vector<8x1xf32>
      tpu.vector_store %arg6[%c0_21, %c0_22], %30 {strides = array<i32>} : memref<8x1xf32, #tpu.memory_space<vmem>>, vector<8x1xf32>,
    } else {
    }
    %c0 = arith.constant 0 : index
    %c0_1 = arith.constant 0 : index
    %3 = vector.load %arg2[%c0, %c0_1] : memref<8x16xf32, #tpu.memory_space<vmem>>, vector<8x16xf32>
    %c0_2 = arith.constant 0 : index
    %c0_3 = arith.constant 0 : index
    %4 = vector.load %arg3[%c0_2, %c0_3] : memref<8x1xi32, #tpu.memory_space<vmem>>, vector<8x1xi32>
    %5 = tpu.iota {dimensions = array<i32: 1>} : vector<8x16xi32>
    %c16_i32 = arith.constant 16 : i32
    %6 = arith.muli %arg1, %c16_i32 : i32
    %7 = vector.broadcast %6 : i32 to vector<8x16xi32>
    %8 = arith.addi %5, %7 : vector<8x16xi32>
    %9 = vector.broadcast %4 : vector<8x1xi32> to vector<8x16xi32>
    %10 = arith.cmpi eq, %8, %9 : vector<8x16xi32>
    %cst = arith.constant 0.000000e+00 : f32
    %11 = vector.broadcast %cst : f32 to vector<8x16xf32>
    %12 = arith.select %10, %3, %11 : vector<8x16xi1>, vector<8x16xf32>
    %cst_4 = arith.constant dense<0.000000e+00> : vector<8xf32>
    %13 = vector.multi_reduction <add>, %12, %cst_4 [1] : vector<8x16xf32> to vector<8xf32>
    %14 = vector.shape_cast %13 : vector<8xf32> to vector<8x1xf32>
    %c0_5 = arith.constant 0 : index
    %c0_6 = arith.constant 0 : index
    %15 = vector.load %arg5[%c0_5, %c0_6] : memref<8x1xf32, #tpu.memory_space<vmem>>, vector<8x1xf32>
    %16 = arith.addf %15, %14 : vector<8x1xf32>
    %c0_7 = arith.constant 0 : index
    %c0_8 = arith.constant 0 : index
    %17 = vector.load %arg5[%c0_7, %c0_8] : memref<8x1xf32, #tpu.memory_space<vmem>>, vector<8x1xf32>
    tpu.vector_store %arg5[%c0_7, %c0_8], %16 {strides = array<i32>} : memref<8x1xf32, #tpu.memory_space<vmem>>, vector<8x1xf32>,
    %cst_9 = arith.constant 0xFF800000 : f32
    %18 = vector.broadcast %cst_9 : f32 to vector<8x16xf32>
    %19 = arith.select %10, %18, %3 : vector<8x16xi1>, vector<8x16xf32>
    %cst_10 = arith.constant dense<0xFF800000> : vector<8xf32>
    %20 = vector.multi_reduction <maximumf>, %19, %cst_10 [1] : vector<8x16xf32> to vector<8xf32>
    %21 = vector.shape_cast %20 : vector<8xf32> to vector<8x1xf32>
    %c0_11 = arith.constant 0 : index
    %c0_12 = arith.constant 0 : index
    %22 = vector.load %arg6[%c0_11, %c0_12] : memref<8x1xf32, #tpu.memory_space<vmem>>, vector<8x1xf32>
    %23 = arith.maximumf %22, %21 : vector<8x1xf32>
    %c0_13 = arith.constant 0 : index
    %c0_14 = arith.constant 0 : index
    %24 = vector.load %arg6[%c0_13, %c0_14] : memref<8x1xf32, #tpu.memory_space<vmem>>, vector<8x1xf32>
    tpu.vector_store %arg6[%c0_13, %c0_14], %23 {strides = array<i32>} : memref<8x1xf32, #tpu.memory_space<vmem>>, vector<8x1xf32>,
    %c0_i32_15 = arith.constant 0 : i32
    %25 = arith.cmpi eq, %arg1, %c0_i32_15 : i32
    %26 = arith.extui %25 : i1 to i32
    %c0_i32_16 = arith.constant 0 : i32
    %27 = arith.cmpi ne, %26, %c0_i32_16 : i32
    scf.if %27 {
      %c0_17 = arith.constant 0 : index
      %c0_18 = arith.constant 0 : index
      %28 = vector.load %arg5[%c0_17, %c0_18] : memref<8x1xf32, #tpu.memory_space<vmem>>, vector<8x1xf32>
      %c0_19 = arith.constant 0 : index
      %c0_20 = arith.constant 0 : index
      %29 = vector.load %arg6[%c0_19, %c0_20] : memref<8x1xf32, #tpu.memory_space<vmem>>, vector<8x1xf32>
      %30 = arith.subf %29, %28 : vector<8x1xf32>
      %c0_21 = arith.constant 0 : index
      %c0_22 = arith.constant 0 : index
      %31 = vector.load %arg4[%c0_21, %c0_22] : memref<8x1xf32, #tpu.memory_space<vmem>>, vector<8x1xf32>
      tpu.vector_store %arg4[%c0_21, %c0_22], %30 {strides = array<i32>} : memref<8x1xf32, #tpu.memory_space<vmem>>, vector<8x1xf32>,
    } else {
    }
    return
  }
  func.func @transform_0(%arg0: i32, %arg1: i32) -> (i32, i32) {
    %c0_i32 = arith.constant 0 : i32
    return %arg0, %arg1 : i32, i32
  }
  func.func @transform_1(%arg0: i32, %arg1: i32) -> (i32, i32) {
    %c0_i32 = arith.constant 0 : i32
    %c0_i32_0 = arith.constant 0 : i32
    return %arg0, %c0_i32 : i32, i32
  }
  func.func @transform_2(%arg0: i32, %arg1: i32) -> (i32, i32) {
    %c0_i32 = arith.constant 0 : i32
    %c0_i32_0 = arith.constant 0 : i32
    return %arg0, %c0_i32 : i32, i32
  }
}

</mosaic_0001>

<bundles_post_ra>
// kernel: tpu_custom_call.1
= control target key start
LH: loop header
LB: loop body
LE: loop exit
PB: predicated region body
PF: predicated region fallthrough
CT: control target
= control target key end

     0   :  { %v60_v0 = vmov 0   ;;  %vm15_vm0 = vcmask 7168   ;;  %v61_v2 = vmov -inf   ;;  %v20_v3 = vlaneseq  ;;  %s92_s1 = inlined_call_operand.vmem [shape: s32[8,1], index: 1, kind: input, shape index: {}]   ;;  %s93_s0 = inlined_call_operand.vmem [shape: f32[8,16], index: 0, kind: input, shape index: {}]   ;;  %s94_s2 = inlined_call_operand.vmem [shape: f32[8,1], index: 2, kind: output, shape index: {}]  }
   0x1   :  { %59 = vset.pattern.permute.xlu0 %v60_v0  ;;  %v19_v1 = vld [vmem:[%s92_s1] sm:$0xff]  ;;  %17 = vst.msk [vmem:[#allocation3] sm:$0xff] %vm15_vm0, %v61_v2  ;;  %vm30_vm1 = vcmask 130048   ;;  %v62_v11 = vmov 0.0  }
   0x2   :  { %26 = vperm.xlu0 %59, %v19_v1   ;;  %v21_v4 = vand.u32 127, %v20_v3  ;;  %v18_v5 = vld [vmem:[%s93_s0] sm:$0xff]  ;;  %16 = vst.msk [vmem:[#allocation2] sm:$0xff] %vm15_vm0, %v62_v11 }
   0x8   :  { %v42_v12 = vld [vmem:[#allocation3] sm:$0xff] }
   0x9   :  { %v34_v13 = vld [vmem:[#allocation2] sm:$0xff] }
  0x74   :  { %v27_v6 = vpop.permute.xlu0 %26 }
  0x75   :  { %vm28_vm2 = vcmp.eq.s32.totalorder %v21_v4, %v27_v6 }
  0x76   :  { %v38_v7 = vsel %vm28_vm2, -inf, %v18_v5  ;;  %v29_v8 = vsel %vm28_vm2, %v18_v5, 0.0 }
  0x77   :  { %v39_v9 = vsel %vm30_vm1, %v38_v7, -inf  ;;  %v31_v10 = vsel %vm30_vm1, %v29_v8, 0.0 }
  0x78   :  { %40 = vmax.xlane.f32.xlu1 %v39_v9  ;;  %32 = vadd.xlane.f32.xlu0 %v31_v10 }
  0xeb   :  { %v41_v14 = vpop.xlane.xlu1 %40  ;;  %v33_v15 = vpop.xlane.xlu0 %32 }
  0xec   :  { %v43_v16 = vmax.f32 %v42_v12, %v41_v14  ;;  %v35_v17 = vadd.f32 %v34_v13, %v33_v15 }
  0xee   :  { %44 = vst.msk [vmem:[#allocation3] sm:$0xff] %vm15_vm0, %v43_v16 }
  0xef   :  { %37 = vst.msk [vmem:[#allocation2] sm:$0xff] %vm15_vm0, %v35_v17 }
  0xf5   :  { %v49_v18 = vld [vmem:[#allocation3] sm:$0xff] }
  0xf6   :  { %v48_v19 = vld [vmem:[#allocation2] sm:$0xff] }
  0xf7   :  { %v50_v20 = vsub.f32 %v49_v18, %v48_v19 }
  0xf9   :  { %51 = vst.msk [vmem:[%s94_s2] sm:$0xff] %vm15_vm0, %v50_v20 }

</bundles_post_ra>
